<compile_context>
chip_gen: v6e
topology: v6e:2x2x1
jax: 0.10.0
libtpu: 0.0.40
codegen_flags: <defaults>
</compile_context>

<pallas_src>
import jax
import jax.numpy as jnp
from jax.experimental import pallas as pl
from jax.experimental.pallas import tpu as pltpu

LANE = 128
SUBLANE = 8


def _round_up(x, m):
    return ((x + m - 1) // m) * m


def cond_embed_kernel(x_ref, wf_ref, bf_ref, o_ref):
    # x_ref : (B_TILE, CPp)  patch-summed activations (bf16 or f32)
    # wf_ref: (CPp,  Hp)     fused (conv @ linear) weight, 1/NP folded in
    # bf_ref: (1,    Hp)     fused bias (f32)
    # o_ref : (B_TILE, Hp)   f32 output
    acc = jnp.dot(x_ref[...], wf_ref[...], preferred_element_type=jnp.float32)
    o_ref[...] = (acc + bf_ref[...]).astype(o_ref.dtype)


def condition_embedder(y, conv_w, conv_b, lin_w, lin_b, *, patch_size,
                       input_dtype=jnp.bfloat16):
    """y: (B, C_in, L) float32.  Returns (B, H) float32."""
    B, C, L = y.shape
    P = patch_size
    assert L % P == 0, "seq_len must be divisible by patch_size"
    NP = L // P
    H = conv_w.shape[0]
    CP = C * P

    # ---- weight prep (exact algebraic fusion; cheap, and under jit it is
    # hoisted/fused by XLA -- cache the fused weights for a per-step embedder).
    w1 = conv_w.reshape(H, CP).T.astype(jnp.float32)          # (CP, H)
    w2 = lin_w.T.astype(jnp.float32)                          # (H, H)
    w_fused = (w1 @ w2) * (1.0 / NP)                          # (CP, H), 1/NP folded
    b_fused = conv_b.astype(jnp.float32) @ w2 + lin_b.astype(jnp.float32)  # (H,)

    # lane-dense padding: K (=C*P) and N (=H) -> multiples of 128
    CPp = _round_up(CP, LANE)
    Hp = _round_up(H, LANE)
    # batch tiling: tiles are multiples of 8 sublanes; "parallel" axis for v7x
    Bp8 = _round_up(B, SUBLANE)
    B_TILE = min(Bp8, 256)
    Bp = _round_up(Bp8, B_TILE)
    grid = (Bp // B_TILE,)

    w_fp = jnp.pad(w_fused, ((0, CPp - CP), (0, Hp - H))).astype(input_dtype)
    b_fp = jnp.pad(b_fused, (0, Hp - H)).reshape(1, Hp).astype(jnp.float32)

    # patch-sum folded into the wrapper (f32, NO transpose needed):
    # sum over patches commutes with the channels-major flatten.
    x_sum = y.astype(jnp.float32).reshape(B, C, NP, P).sum(axis=2).reshape(B, CP)
    x_p = jnp.pad(x_sum, ((0, Bp - B), (0, CPp - CP))).astype(input_dtype)

    out = pl.pallas_call(
        cond_embed_kernel,
        out_shape=jax.ShapeDtypeStruct((Bp, Hp), jnp.float32),
        grid=grid,
        in_specs=[
            pl.BlockSpec((B_TILE, CPp), lambda i: (i, 0)),
            pl.BlockSpec((CPp, Hp), lambda i: (0, 0)),
            pl.BlockSpec((1, Hp), lambda i: (0, 0)),
        ],
        out_specs=pl.BlockSpec((B_TILE, Hp), lambda i: (i, 0)),
        compiler_params=pltpu.CompilerParams(
            dimension_semantics=("parallel",)),
    )(x_p, w_fp, b_fp)

    return out[:B, :H]


condition_embedder_jit = jax.jit(
    condition_embedder, static_argnames=("patch_size", "input_dtype"))


def condition_embedder_ref(y, conv_w, conv_b, lin_w, lin_b, patch_size):
    """Plain-JAX reference matching the PyTorch forward (no fusion)."""
    B, C, L = y.shape
    P = patch_size
    NP = L // P
    H = conv_w.shape[0]
    y_patches = y.reshape(B, C, NP, P).transpose(0, 2, 1, 3).reshape(B, NP, C * P)
    w1 = conv_w.reshape(H, C * P)
    conv_out = jnp.einsum("bpk,hk->bph", y_patches, w1) + conv_b   # (B, NP, H)
    pooled = conv_out.mean(axis=1)                                 # (B, H)
    return pooled @ lin_w.T + lin_b                                # (B, H)


if __name__ == "__main__":
    # small shapes consistent with the module
    B, C_in, SEQ_LEN, PATCH, HIDDEN = 2, 4, 16, 4, 32

    key = jax.random.PRNGKey(0)
    k_y, k_cw, k_cb, k_lw, k_lb = jax.random.split(key, 5)

    y = jax.random.normal(k_y, (B, C_in, SEQ_LEN), dtype=jnp.float32)
    conv_w = 0.1 * jax.random.normal(k_cw, (HIDDEN, C_in, PATCH), dtype=jnp.float32)
    conv_b = 0.1 * jax.random.normal(k_cb, (HIDDEN,), dtype=jnp.float32)
    lin_w = 0.1 * jax.random.normal(k_lw, (HIDDEN, HIDDEN), dtype=jnp.float32)
    lin_b = 0.1 * jax.random.normal(k_lb, (HIDDEN,), dtype=jnp.float32)

    ref = condition_embedder_ref(y, conv_w, conv_b, lin_w, lin_b, PATCH)

    # f32 path: tight tolerance (only the algebraic-fusion reassociation differs)
    out_f32 = condition_embedder_jit(y, conv_w, conv_b, lin_w, lin_b,
                                     patch_size=PATCH, input_dtype=jnp.float32)
    out_f32 = jax.block_until_ready(out_f32)
    assert out_f32.shape == (B, HIDDEN)
    assert jnp.allclose(out_f32, ref, atol=1e-4, rtol=1e-4), "f32 mismatch vs reference"

    # bf16-input path (default, f32 accumulate): bf16-appropriate tolerance
    out_bf16 = condition_embedder_jit(y, conv_w, conv_b, lin_w, lin_b,
                                      patch_size=PATCH, input_dtype=jnp.bfloat16)
    out_bf16 = jax.block_until_ready(out_bf16)
    assert out_bf16.shape == (B, HIDDEN)
    assert jnp.allclose(out_bf16, ref, atol=1e-2, rtol=1e-2), "bf16 mismatch vs reference"

    print("KERNEL_OK")
</pallas_src>

<mosaic_0001>
module attributes {stable_mosaic.version = 11 : i64} {
  func.func @cond_embed_kernel(%arg0: i32, %arg1: memref<8x128xf32, #tpu.memory_space<vmem>>, %arg2: memref<128x128xf32, #tpu.memory_space<vmem>>, %arg3: memref<1x128xf32, #tpu.memory_space<vmem>>, %arg4: memref<8x128xf32, #tpu.memory_space<vmem>>) attributes {dimension_semantics = [#tpu.dimension_semantics<parallel>], iteration_bounds = array<i64: 1>, scalar_prefetch = 0 : i64, scratch_operands = 0 : i64, tpu.core_type = #tpu.core_type<tc>, window_params = [{transform_indices = @transform_0, window_bounds = array<i64: 8, 128>}, {pipeline_mode = #tpu.pipeline_mode<synchronous>, transform_indices = @transform_1, window_bounds = array<i64: 128, 128>}, {pipeline_mode = #tpu.pipeline_mode<synchronous>, transform_indices = @transform_2, window_bounds = array<i64: 1, 128>}, {transform_indices = @transform_3, window_bounds = array<i64: 8, 128>}]} {
    %c0 = arith.constant 0 : index
    %c0_0 = arith.constant 0 : index
    %0 = vector.load %arg1[%c0, %c0_0] : memref<8x128xf32, #tpu.memory_space<vmem>>, vector<8x128xf32>
    %c0_1 = arith.constant 0 : index
    %c0_2 = arith.constant 0 : index
    %1 = vector.load %arg2[%c0_1, %c0_2] : memref<128x128xf32, #tpu.memory_space<vmem>>, vector<128x128xf32>
    %cst = arith.constant dense<0.000000e+00> : vector<8x128xf32>
    %2 = tpu.matmul %0, %1, %cst {dimension_numbers = #tpu.dot_dimension_numbers<[1], [0], [0], [1], [0, 0, 1, 1], [], []>} : vector<8x128xf32>, vector<128x128xf32>, vector<8x128xf32> -> vector<8x128xf32>
    %c0_3 = arith.constant 0 : index
    %c0_4 = arith.constant 0 : index
    %3 = vector.load %arg3[%c0_3, %c0_4] : memref<1x128xf32, #tpu.memory_space<vmem>>, vector<1x128xf32>
    %4 = vector.broadcast %3 : vector<1x128xf32> to vector<8x128xf32>
    %5 = arith.addf %2, %4 : vector<8x128xf32>
    %c0_5 = arith.constant 0 : index
    %c0_6 = arith.constant 0 : index
    %6 = vector.load %arg4[%c0_5, %c0_6] : memref<8x128xf32, #tpu.memory_space<vmem>>, vector<8x128xf32>
    tpu.vector_store %arg4[%c0_5, %c0_6], %5 {strides = array<i32>} : memref<8x128xf32, #tpu.memory_space<vmem>>, vector<8x128xf32>,
    return
  }
  func.func @transform_0(%arg0: i32) -> (i32, i32) {
    %c0_i32 = arith.constant 0 : i32
    %c0_i32_0 = arith.constant 0 : i32
    return %arg0, %c0_i32 : i32, i32
  }
  func.func @transform_1(%arg0: i32) -> (i32, i32) {
    %c0_i32 = arith.constant 0 : i32
    %c0_i32_0 = arith.constant 0 : i32
    %c0_i32_1 = arith.constant 0 : i32
    return %c0_i32, %c0_i32_0 : i32, i32
  }
  func.func @transform_2(%arg0: i32) -> (i32, i32) {
    %c0_i32 = arith.constant 0 : i32
    %c0_i32_0 = arith.constant 0 : i32
    %c0_i32_1 = arith.constant 0 : i32
    return %c0_i32, %c0_i32_0 : i32, i32
  }
  func.func @transform_3(%arg0: i32) -> (i32, i32) {
    %c0_i32 = arith.constant 0 : i32
    %c0_i32_0 = arith.constant 0 : i32
    return %arg0, %c0_i32 : i32, i32
  }
}

</mosaic_0001>

<bundles_post_ra>
// kernel: condition_embedder.1
= control target key start
LH: loop header
LB: loop body
LE: loop exit
PB: predicated region body
PF: predicated region fallthrough
CT: control target
= control target key end

     0   :  { %v168_v0 = vmov 0.0   ;;  %vm169_vm0 = vmmov 0   ;;  %s247_s1 = inlined_call_operand.vmem [shape: f32[128,128], index: 1, kind: input, shape index: {}]   ;;  %s248_s0 = inlined_call_operand.vmem [shape: f32[8,128], index: 0, kind: input, shape index: {}]   ;;  %s249_s2 = inlined_call_operand.vmem [shape: f32[1,128], index: 2, kind: input, shape index: {}]   ;;  %s250_s3 = inlined_call_operand.vmem [shape: f32[8,128], index: 3, kind: output, shape index: {}]  }
   0x1   :  { %131 = vmatprep.subr.mxu0 %v168_v0  ;;  %v30_v1 = vld [vmem:[%s247_s1 + $0x78] sm:$0xff]  ;;  %v29_v2 = vld [vmem:[%s247_s1 + $0x70] sm:$0xff]  ;;  %163 = vmatprep.mubr.msk.f32.mxu0 %vm169_vm0, %v168_v0  ;;  %v28_v3 = vld [vmem:[%s247_s1 + $0x68] sm:$0xff] }
   0x2   :  { %132 = vmatpush3.msra.mxu0 %v30_v1  ;;  %v27_v4 = vld [vmem:[%s247_s1 + $0x60] sm:$0xff]  ;;  %v26_v5 = vld [vmem:[%s247_s1 + $0x58] sm:$0xff]  ;;  %v25_v6 = vld [vmem:[%s247_s1 + $0x50] sm:$0xff] }
   0x3   :  { %133 = vmatprep.subr.mxu0 %v168_v0  ;;  %v24_v7 = vld [vmem:[%s247_s1 + $0x48] sm:$0xff]  ;;  %v23_v8 = vld [vmem:[%s247_s1 + $0x40] sm:$0xff]  ;;  %v22_v9 = vld [vmem:[%s247_s1 + $0x38] sm:$0xff] }
   0x4   :  { %134 = vmatpush3.msra.mxu0 %v29_v2  ;;  %v21_v10 = vld [vmem:[%s247_s1 + $0x30] sm:$0xff]  ;;  %v20_v11 = vld [vmem:[%s247_s1 + $0x28] sm:$0xff]  ;;  %v19_v12 = vld [vmem:[%s247_s1 + $0x20] sm:$0xff] }
   0x5   :  { %135 = vmatprep.subr.mxu0 %v168_v0  ;;  %v18_v13 = vld [vmem:[%s247_s1 + $0x18] sm:$0xff]  ;;  %v17_v14 = vld [vmem:[%s247_s1 + $0x10] sm:$0xff]  ;;  %v16_v15 = vld [vmem:[%s247_s1 + $0x8] sm:$0xff] }
   0x6   :  { %136 = vmatpush3.msra.mxu0 %v28_v3  ;;  %v15_v16 = vld [vmem:[%s247_s1] sm:$0xff] }
   0x7   :  { %137 = vmatprep.subr.mxu0 %v168_v0  ;;  %v14_v17 = vld [vmem:[%s248_s0] sm:$0xff] }
   0x8   :  { %138 = vmatpush3.msra.mxu0 %v27_v4  ;;  %v113_v18 = vld [vmem:[%s249_s2] ss:$0 sm:$0xff] }
   0x9   :  { %139 = vmatprep.subr.mxu0 %v168_v0 }
   0xa   :  { %140 = vmatpush3.msra.mxu0 %v26_v5 }
   0xb   :  { %141 = vmatprep.subr.mxu0 %v168_v0 }
   0xc   :  { %142 = vmatpush3.msra.mxu0 %v25_v6 }
   0xd   :  { %143 = vmatprep.subr.mxu0 %v168_v0 }
   0xe   :  { %144 = vmatpush3.msra.mxu0 %v24_v7 }
   0xf   :  { %145 = vmatprep.subr.mxu0 %v168_v0 }
  0x10   :  { %146 = vmatpush3.msra.mxu0 %v23_v8 }
  0x11   :  { %147 = vmatprep.subr.mxu0 %v168_v0 }
  0x12   :  { %148 = vmatpush3.msra.mxu0 %v22_v9 }
  0x13   :  { %149 = vmatprep.subr.mxu0 %v168_v0 }
  0x14   :  { %150 = vmatpush3.msra.mxu0 %v21_v10 }
  0x15   :  { %151 = vmatprep.subr.mxu0 %v168_v0 }
  0x16   :  { %152 = vmatpush3.msra.mxu0 %v20_v11 }
  0x17   :  { %153 = vmatprep.subr.mxu0 %v168_v0 }
  0x18   :  { %154 = vmatpush3.msra.mxu0 %v19_v12 }
  0x19   :  { %155 = vmatprep.subr.mxu0 %v168_v0 }
  0x1a   :  { %156 = vmatpush3.msra.mxu0 %v18_v13 }
  0x1b   :  { %157 = vmatprep.subr.mxu0 %v168_v0 }
  0x1c   :  { %158 = vmatpush3.msra.mxu0 %v17_v14 }
  0x1d   :  { %159 = vmatprep.subr.mxu0 %v168_v0 }
  0x1e   :  { %160 = vmatpush3.msra.mxu0 %v16_v15 }
  0x1f   :  { %161 = vmatprep.subr.mxu0 %v168_v0 }
  0x20   :  { %162 = vmatpush3.msra.mxu0 %v15_v16 }
  0x21   :  { %164 = vmatmul.mubr.f32.vlgmr.msra.gmra.mxu0 %v14_v17 }
  0xe1   :  { %v104_v19 = vpop.f32.mrf.mxu0 }
  0xe2   :  { %v105_v20 = vadd.f32 %v113_v18, %v104_v19 }
  0xe3   :  { %v165_v21 = vpop.f32.mrf.mxu0 }
  0xe4   :  { %108 = vst [vmem:[%s250_s3] sm:$0xff] %v105_v20 }

</bundles_post_ra>
